<compile_context>
chip_gen: v7x
topology: tpu7x:2x2x1
jax: 0.10.0
libtpu: 0.0.40
codegen_flags: <defaults>
</compile_context>

<pallas_src>
import numpy as np
import jax
import jax.numpy as jnp
from jax.experimental import pallas as pl
from jax.experimental.pallas import tpu as pltpu


def make_dwsep_conv2d(w_dw, b_dw, w_pw, b_pw, in_shape, *,
                      stride=1, padding=0, dilation=1, operand_dtype=None):
    """Build a jitted apply(x_nchw) matching DepthWiseConv2d.forward (NCHW -> NCHW).

    All weight folding and static layout metadata are computed once here.
    """
    N, C, H, W = (int(d) for d in in_shape)
    KH, KW = int(w_dw.shape[2]), int(w_dw.shape[3])
    Cout = int(w_pw.shape[0])
    S, P, D = int(stride), int(padding), int(dilation)

    OH = (H + 2 * P - D * (KH - 1) - 1) // S + 1
    OW = (W + 2 * P - D * (KW - 1) - 1) // S + 1
    Hpad, Wpad = H + 2 * P, W + 2 * P
    Hp, Wp = -(-Hpad // S), -(-Wpad // S)            # rows / cols per stride-phase
    n_ph = S * S
    WpC, OWCo = Wp * C, OW * Cout
    odt = (jnp.dtype(operand_dtype) if operand_dtype is not None
           else jnp.asarray(w_dw).dtype)

    # ---- static tap -> row-block structure --------------------------------------------
    # Tap (kh, kw) reads padded row oh*S + kh*D = (oh+qh)*S + rh and padded column
    # ow*S + kw*D = (ow+qw)*S + rw.  Group taps by (kh, rw): each block is a single
    # contiguous OH-row slab of phase (rh, rw) (static sublane slice in-kernel); the
    # kw / qw column shifts are absorbed into the combined weight, no lane shifts.
    blocks = []                                      # (kh, rh, qh, rw)
    for kh in range(KH):
        rh, qh = (kh * D) % S, (kh * D) // S
        seen = []
        for kw in range(KW):
            rw = (kw * D) % S
            if rw not in seen:
                seen.append(rw)
                blocks.append((kh, rh, qh, rw))
    n_blk = len(blocks)
    block_meta = tuple((rh * S + rw, qh) for (_, rh, qh, rw) in blocks)

    # ---- combined depthwise + pointwise weight (one-time) ------------------------------
    # W_comb[blk, (j, c), (ow, cout)] =
    #   sum_{kw : (kw*D)%S == rw_blk, j == ow + qw(kw)}  w_dw[c,0,kh_blk,kw] * w_pw[cout,c]
    sel = np.zeros((n_blk, Wp, OW, KW), dtype=np.float32)
    for bi, (kh, rh, qh, rw) in enumerate(blocks):
        for kw in range(KW):
            if (kw * D) % S != rw:
                continue
            qw = (kw * D) // S
            for ow in range(OW):
                sel[bi, ow + qw, ow, kw] = 1.0
    wdw_mat = jnp.asarray(w_dw)[:, 0, :, :]                          # (C, KH, KW)
    wpw_mat = jnp.asarray(w_pw)[:, :, 0, 0]                          # (Cout, C)
    kh_idx = np.array([kh for (kh, _, _, _) in blocks], dtype=np.int32)
    wdw_blk = jnp.transpose(wdw_mat, (1, 0, 2))[kh_idx]              # (n_blk, C, KW)
    w_comb = jnp.einsum('bjok,bck,tc->bjcot', jnp.asarray(sel), wdw_blk, wpw_mat)
    w_comb = w_comb.reshape(n_blk, WpC, OWCo).astype(odt)            # (n_blk, Wp*C, OW*Cout)

    # Depthwise bias folded through the (linear) pointwise conv; tiled over OW lanes.
    b_eff = (wpw_mat.astype(jnp.float32) @ jnp.asarray(b_dw, jnp.float32)
             + jnp.asarray(b_pw, jnp.float32))                       # (Cout,)
    b_tiled = jnp.tile(b_eff, OW).reshape(1, OWCo)                   # (1, OW*Cout), f32

    # ---- grid / batch sub-block --------------------------------------------------------
    # NB images per grid step (matmul M = NB*OH) to amortize per-step overhead and fill
    # the MXU, while keeping >= 2 "parallel" steps when N allows (v7x has 2 TCs).
    nb = max(1, N // 8)
    while N % nb:
        nb -= 1
    if OH % 8 != 0:                  # keep batch stacking sublane-tile aligned
        nb = 1
    grid = (N // nb,)

    # ---- kernel ------------------------------------------------------------------------
    def kernel(x_ref, wc_ref, bias_ref, out_ref):
        # x_ref   : (NB, S*S, Hp, Wp*C)    zero-padded, phase-decomposed NHWC input
        # wc_ref  : (n_blk, Wp*C, OW*Cout) combined depthwise+pointwise weights
        # bias_ref: (1, OW*Cout)           fused bias (f32)
        # out_ref : (NB, OH, OW*Cout)      lane-dense output slab
        acc = None
        for bi, (p, qh) in enumerate(block_meta):
            if nb == 1:
                blk = x_ref[0, p, qh:qh + OH, :]                     # (OH, Wp*C)
            else:
                blk = jnp.concatenate(                               # (NB*OH, Wp*C)
                    [x_ref[b, p, qh:qh + OH, :] for b in range(nb)], axis=0)
            part = jnp.dot(blk, wc_ref[bi], preferred_element_type=jnp.float32)
            acc = part if acc is None else acc + part                # f32 accumulate
        acc = acc + bias_ref[...]
        for b in range(nb):
            out_ref[b] = acc[b * OH:(b + 1) * OH].astype(out_ref.dtype)

    call = pl.pallas_call(
        kernel,
        out_shape=jax.ShapeDtypeStruct((N, OH, OWCo), jnp.float32),
        grid_spec=pltpu.PrefetchScalarGridSpec(
            num_scalar_prefetch=0,
            grid=grid,
            in_specs=[
                pl.BlockSpec((nb, n_ph, Hp, WpC), lambda n: (n, 0, 0, 0)),
                pl.BlockSpec((n_blk, WpC, OWCo), lambda n: (0, 0, 0)),
                pl.BlockSpec((1, OWCo), lambda n: (0, 0)),
            ],
            out_specs=pl.BlockSpec((nb, OH, OWCo), lambda n: (n, 0, 0)),
        ),
        compiler_params=pltpu.CompilerParams(dimension_semantics=("parallel",)),
    )

    @jax.jit
    def apply(x_nchw):
        # Per-call work is pure layout plumbing: NCHW -> NHWC, zero-pad, phase-decompose.
        # The input is NOT replicated per tap (1x HBM traffic).
        # TODO(synk): skip the NCHW<->NHWC transposes if the surrounding model is NHWC.
        x = jnp.transpose(x_nchw, (0, 2, 3, 1))
        x = jnp.pad(x, ((0, 0),
                        (P, Hp * S - Hpad + P),
                        (P, Wp * S - Wpad + P),
                        (0, 0)))
        x = x.reshape(N, Hp, S, Wp, S, C).transpose(0, 2, 4, 1, 3, 5)
        x = x.reshape(N, n_ph, Hp, WpC).astype(odt)
        out = call(x, w_comb, b_tiled)
        out = out.reshape(N, OH, OW, Cout).astype(x_nchw.dtype)
        return jnp.transpose(out, (0, 3, 1, 2))

    return apply


def _reference(x, w_dw, b_dw, w_pw, b_pw, stride, padding, dilation):
    """Pure-JAX reference replicating torch.nn.Conv2d semantics."""
    C = x.shape[1]
    dw = jax.lax.conv_general_dilated(
        x, w_dw, window_strides=(stride, stride),
        padding=[(padding, padding), (padding, padding)],
        rhs_dilation=(dilation, dilation),
        dimension_numbers=("NCHW", "OIHW", "NCHW"),
        feature_group_count=C)
    dw = dw + b_dw.reshape(1, C, 1, 1)
    pw = jax.lax.conv_general_dilated(
        dw, w_pw, window_strides=(1, 1), padding=[(0, 0), (0, 0)],
        dimension_numbers=("NCHW", "OIHW", "NCHW"))
    return pw + b_pw.reshape(1, -1, 1, 1)


if __name__ == "__main__":
    # Module config: in_channels=4, out_channels=8, kernel_size=3, bias=True
    C, Cout, K = 4, 8, 3
    key = jax.random.PRNGKey(0)
    k1, k2, k3, k4, k5, k6 = jax.random.split(key, 6)
    # PyTorch parameter shapes: depthwise weight (C,1,K,K); pointwise weight (Cout,C,1,1).
    w_dw = jax.random.normal(k2, (C, 1, K, K), jnp.float32) * 0.1
    b_dw = jax.random.normal(k3, (C,), jnp.float32) * 0.1
    w_pw = jax.random.normal(k4, (Cout, C, 1, 1), jnp.float32) * 0.1
    b_pw = jax.random.normal(k5, (Cout,), jnp.float32) * 0.1

    x2 = jax.random.normal(k1, (2, C, 16, 16), jnp.float32)
    x16 = jax.random.normal(k6, (16, C, 16, 16), jnp.float32)

    # f32 path: module default (s=1,p=0,d=1), stride/padding/dilation variants, and a
    # larger batch that exercises the NB>1 (multiple images per grid step) path.
    cases = [
        (x2, 1, 0, 1),
        (x2, 1, 1, 1),
        (x2, 2, 1, 1),
        (x2, 1, 2, 2),
        (x16, 1, 1, 1),
    ]
    for x, s, p, d in cases:
        fn = make_dwsep_conv2d(w_dw, b_dw, w_pw, b_pw, x.shape,
                               stride=s, padding=p, dilation=d)
        out = jax.block_until_ready(fn(x))
        ref = _reference(x, w_dw, b_dw, w_pw, b_pw, s, p, d)
        assert out.shape == ref.shape, (out.shape, ref.shape)
        assert jnp.allclose(out, ref, rtol=1e-4, atol=1e-4), \
            f"mismatch vs reference conv (s={s}, p={p}, d={d}, N={x.shape[0]})"

    # bf16-operand / f32-accumulate path (MXU fast path on v6e/v7x, half the DMA bytes).
    fn_bf16 = make_dwsep_conv2d(w_dw, b_dw, w_pw, b_pw, x2.shape,
                                stride=1, padding=1, dilation=1,
                                operand_dtype=jnp.bfloat16)
    out = jax.block_until_ready(fn_bf16(x2))
    ref = _reference(x2, w_dw, b_dw, w_pw, b_pw, 1, 1, 1)
    assert out.shape == ref.shape
    assert jnp.allclose(out, ref, rtol=1e-1, atol=1e-1), "bf16 path out of tolerance"

    print("KERNEL_OK")
</pallas_src>

<mosaic_0001>
module attributes {stable_mosaic.version = 11 : i64} {
  func.func @kernel(%arg0: i32, %arg1: memref<1x1x16x64xf32, #tpu.memory_space<vmem>>, %arg2: memref<3x64x112xf32, #tpu.memory_space<vmem>>, %arg3: memref<1x112xf32, #tpu.memory_space<vmem>>, %arg4: memref<1x14x112xf32, #tpu.memory_space<vmem>>) attributes {dimension_semantics = [#tpu.dimension_semantics<parallel>], iteration_bounds = array<i64: 2>, scalar_prefetch = 0 : i64, scratch_operands = 0 : i64, tpu.core_type = #tpu.core_type<tc>, window_params = [{transform_indices = @transform_0, window_bounds = array<i64: 1, 1, 16, 64>}, {pipeline_mode = #tpu.pipeline_mode<synchronous>, transform_indices = @transform_1, window_bounds = array<i64: 3, 64, 112>}, {pipeline_mode = #tpu.pipeline_mode<synchronous>, transform_indices = @transform_2, window_bounds = array<i64: 1, 112>}, {transform_indices = @transform_3, window_bounds = array<i64: 1, 14, 112>}]} {
    %c0 = arith.constant 0 : index
    %c0_0 = arith.constant 0 : index
    %c0_1 = arith.constant 0 : index
    %c0_2 = arith.constant 0 : index
    %0 = vector.load %arg1[%c0, %c0_0, %c0_1, %c0_2] : memref<1x1x16x64xf32, #tpu.memory_space<vmem>>, vector<1x1x14x64xf32>
    %1 = vector.shape_cast %0 : vector<1x1x14x64xf32> to vector<14x64xf32>
    %c0_3 = arith.constant 0 : index
    %c0_4 = arith.constant 0 : index
    %c0_5 = arith.constant 0 : index
    %2 = vector.load %arg2[%c0_3, %c0_4, %c0_5] : memref<3x64x112xf32, #tpu.memory_space<vmem>>, vector<1x64x112xf32>
    %3 = vector.shape_cast %2 : vector<1x64x112xf32> to vector<64x112xf32>
    %cst = arith.constant dense<0.000000e+00> : vector<14x112xf32>
    %4 = tpu.matmul %1, %3, %cst {dimension_numbers = #tpu.dot_dimension_numbers<[1], [0], [0], [1], [0, 0, 1, 1], [], []>} : vector<14x64xf32>, vector<64x112xf32>, vector<14x112xf32> -> vector<14x112xf32>
    %c0_6 = arith.constant 0 : index
    %c0_7 = arith.constant 0 : index
    %c1 = arith.constant 1 : index
    %c0_8 = arith.constant 0 : index
    %5 = vector.load %arg1[%c0_6, %c0_7, %c1, %c0_8] : memref<1x1x16x64xf32, #tpu.memory_space<vmem>>, vector<1x1x14x64xf32>
    %6 = vector.shape_cast %5 : vector<1x1x14x64xf32> to vector<14x64xf32>
    %c1_9 = arith.constant 1 : index
    %c0_10 = arith.constant 0 : index
    %c0_11 = arith.constant 0 : index
    %7 = vector.load %arg2[%c1_9, %c0_10, %c0_11] : memref<3x64x112xf32, #tpu.memory_space<vmem>>, vector<1x64x112xf32>
    %8 = vector.shape_cast %7 : vector<1x64x112xf32> to vector<64x112xf32>
    %cst_12 = arith.constant dense<0.000000e+00> : vector<14x112xf32>
    %9 = tpu.matmul %6, %8, %cst_12 {dimension_numbers = #tpu.dot_dimension_numbers<[1], [0], [0], [1], [0, 0, 1, 1], [], []>} : vector<14x64xf32>, vector<64x112xf32>, vector<14x112xf32> -> vector<14x112xf32>
    %10 = arith.addf %4, %9 : vector<14x112xf32>
    %c0_13 = arith.constant 0 : index
    %c0_14 = arith.constant 0 : index
    %c2 = arith.constant 2 : index
    %c0_15 = arith.constant 0 : index
    %11 = vector.load %arg1[%c0_13, %c0_14, %c2, %c0_15] : memref<1x1x16x64xf32, #tpu.memory_space<vmem>>, vector<1x1x14x64xf32>
    %12 = vector.shape_cast %11 : vector<1x1x14x64xf32> to vector<14x64xf32>
    %c2_16 = arith.constant 2 : index
    %c0_17 = arith.constant 0 : index
    %c0_18 = arith.constant 0 : index
    %13 = vector.load %arg2[%c2_16, %c0_17, %c0_18] : memref<3x64x112xf32, #tpu.memory_space<vmem>>, vector<1x64x112xf32>
    %14 = vector.shape_cast %13 : vector<1x64x112xf32> to vector<64x112xf32>
    %cst_19 = arith.constant dense<0.000000e+00> : vector<14x112xf32>
    %15 = tpu.matmul %12, %14, %cst_19 {dimension_numbers = #tpu.dot_dimension_numbers<[1], [0], [0], [1], [0, 0, 1, 1], [], []>} : vector<14x64xf32>, vector<64x112xf32>, vector<14x112xf32> -> vector<14x112xf32>
    %16 = arith.addf %10, %15 : vector<14x112xf32>
    %c0_20 = arith.constant 0 : index
    %c0_21 = arith.constant 0 : index
    %17 = vector.load %arg3[%c0_20, %c0_21] : memref<1x112xf32, #tpu.memory_space<vmem>>, vector<1x112xf32>
    %18 = vector.broadcast %17 : vector<1x112xf32> to vector<14x112xf32>
    %19 = arith.addf %16, %18 : vector<14x112xf32>
    %c0_22 = arith.constant 0 : index
    %c0_23 = arith.constant 0 : index
    %c0_24 = arith.constant 0 : index
    %20 = vector.load %arg4[%c0_22, %c0_23, %c0_24] : memref<1x14x112xf32, #tpu.memory_space<vmem>>, vector<1x14x112xf32>
    %21 = vector.shape_cast %20 : vector<1x14x112xf32> to vector<14x112xf32>
    %22 = vector.shape_cast %19 : vector<14x112xf32> to vector<1x14x112xf32>
    tpu.vector_store %arg4[%c0_22, %c0_23, %c0_24], %22 {strides = array<i32>} : memref<1x14x112xf32, #tpu.memory_space<vmem>>, vector<1x14x112xf32>,
    return
  }
  func.func @transform_0(%arg0: i32) -> (i32, i32, i32, i32) {
    %c0_i32 = arith.constant 0 : i32
    %c0_i32_0 = arith.constant 0 : i32
    %c0_i32_1 = arith.constant 0 : i32
    %c0_i32_2 = arith.constant 0 : i32
    return %arg0, %c0_i32, %c0_i32_0, %c0_i32_1 : i32, i32, i32, i32
  }
  func.func @transform_1(%arg0: i32) -> (i32, i32, i32) {
    %c0_i32 = arith.constant 0 : i32
    %c0_i32_0 = arith.constant 0 : i32
    %c0_i32_1 = arith.constant 0 : i32
    %c0_i32_2 = arith.constant 0 : i32
    return %c0_i32, %c0_i32_0, %c0_i32_1 : i32, i32, i32
  }
  func.func @transform_2(%arg0: i32) -> (i32, i32) {
    %c0_i32 = arith.constant 0 : i32
    %c0_i32_0 = arith.constant 0 : i32
    %c0_i32_1 = arith.constant 0 : i32
    return %c0_i32, %c0_i32_0 : i32, i32
  }
  func.func @transform_3(%arg0: i32) -> (i32, i32, i32) {
    %c0_i32 = arith.constant 0 : i32
    %c0_i32_0 = arith.constant 0 : i32
    %c0_i32_1 = arith.constant 0 : i32
    return %arg0, %c0_i32, %c0_i32_0 : i32, i32, i32
  }
}

</mosaic_0001>

<bundles_post_ra>
// kernel: apply.1
= control target key start
LH: loop header
LB: loop body
LE: loop exit
PB: predicated region body
PF: predicated region fallthrough
CT: control target
= control target key end

     0   :  { %s728_s12 = smov 0   ;;  %s841_s0 = inlined_call_operand.vmem [shape: f32[2,1,16,64], index: 0, kind: input, shape index: {}]   ;;  %s842_s1 = inlined_call_operand.vmem [shape: f32[3,64,112], index: 1, kind: input, shape index: {}]   ;;  %s843_s2 = inlined_call_operand.vmem [shape: f32[1,112], index: 2, kind: input, shape index: {}]   ;;  %s844_s3 = inlined_call_operand.vmem [shape: f32[2,14,112], index: 3, kind: output, shape index: {}]  }
   0x1 LB: > { %s517_s13 = sadd.s32 4294967295, %s706_s12   ;;  %p521_p0 = scmp.ge.s32.totalorder %s706_s12, 1  ;;  %s706_s12 = sphi %s728_s12, %s13_s12  }
   0x2   : > { %p137_p1 = scmp.lt.s32.totalorder %s706_s12, 3 }
   0x4   : > { %p138_p2 = pnand %p521_p0, %p137_p1 }
   0x5   : > { %v173_v0 = vld [vmem:[%s842_s1] sm:$0xff] (!%p138_p2)  ;;  %v174_v1 = vld [vmem:[%s842_s1 + $0x8] sm:$0xff] (!%p138_p2)  ;;  %v175_v2 = vld [vmem:[%s842_s1 + $0x10] sm:$0xff] (!%p138_p2)  ;;  %p161_p3 = scmp.lt.s32.totalorder (!%p138_p2), %s517_s13, 1  ;;  %vm192_vm0 = vcmask (!%p138_p2), 523264   ;;  %vm460_vm1 = vcmask (!%p138_p2), 914432  }
   0x6   : > { %141 = sbr.rel (%p138_p2) target bundleno = 258 (0x102), region = 32  ;;  %v656_v3 = vpack.c.bf16 (!%p138_p2), %v174_v1, %v173_v0  ;;  %v176_v4 = vld [vmem:[%s842_s1 + $0x18] sm:$0xff] (!%p138_p2)  ;;  %v177_v6 = vld [vmem:[%s842_s1 + $0x20] sm:$0xff] (!%p138_p2)  ;;  %v178_v7 = vld [vmem:[%s842_s1 + $0x28] sm:$0xff] (!%p138_p2)  ;;  %vm458_vm2 = vcmask (!%p138_p2), 916480  }
   0x7   : > { %v660_v5 = vpack.c.bf16 (!%p138_p2), %v176_v4, %v175_v2  ;;  %v526_v8 = vld [vmem:[%s842_s1 + $0x40] sm:$0xff] (!%p138_p2)  ;;  %v527_v9 = vld [vmem:[%s842_s1 + $0x48] sm:$0xff] (!%p138_p2)  ;;  %v528_v11 = vld [vmem:[%s842_s1 + $0x50] sm:$0xff] (!%p138_p2)  ;;  %v664_v13 = vpack.c.bf16 (!%p138_p2), %v178_v7, %v177_v6 }
   0x8   : > { %657 = vmatprep.subr.bf16.mxu0 (!%p138_p2), %v656_v3  ;;  %v640_v10 = vpack.c.bf16 (!%p138_p2), %v527_v9, %v526_v8  ;;  %v529_v12 = vld [vmem:[%s842_s1 + $0x58] sm:$0xff] (!%p138_p2)  ;;  %v530_v15 = vld [vmem:[%s842_s1 + $0x60] sm:$0xff] (!%p138_p2)  ;;  %v531_v16 = vld [vmem:[%s842_s1 + $0x68] sm:$0xff] (!%p138_p2) }
   0x9   : > { %659 = vmatpush3.bf16.msra.mxu0 (!%p138_p2), %v656_v3  ;;  %v644_v14 = vpack.c.bf16 (!%p138_p2), %v529_v12, %v528_v11  ;;  %v179_v17 = vld [vmem:[%s842_s1 + $0x30] sm:$0xff] (!%p138_p2)  ;;  %v180_v18 = vld [vmem:[%s842_s1 + $0x38] sm:$0xff] (!%p138_p2)  ;;  %v648_v20 = vpack.c.bf16 (!%p138_p2), %v531_v16, %v530_v15  ;;  %v538_v25 = vld [vmem:[%s842_s1 + $0x80] sm:$0xff] (!%p138_p2) }
   0xa   : > { %661 = vmatprep.subr.bf16.mxu0 (!%p138_p2), %v660_v5  ;;  %641 = vmatprep.subr.bf16.mxu1 (!%p138_p2), %v640_v10  ;;  %v668_v22 = vpack.c.bf16 (!%p138_p2), %v180_v18, %v179_v17  ;;  %v532_v23 = vld [vmem:[%s842_s1 + $0x70] sm:$0xff] (!%p138_p2)  ;;  %v533_v24 = vld [vmem:[%s842_s1 + $0x78] sm:$0xff] (!%p138_p2)  ;;  %v539_v26 = vld [vmem:[%s842_s1 + $0x88] sm:$0xff] (!%p138_p2) }
   0xb   : > { %643 = vmatpush3.bf16.msra.mxu1 (!%p138_p2), %v640_v10  ;;  %v652_v27 = vpack.c.bf16 (!%p138_p2), %v533_v24, %v532_v23  ;;  %v672_v28 = vpack.c.bf16 (!%p138_p2), %v539_v26, %v538_v25  ;;  %v540_v29 = vld [vmem:[%s842_s1 + $0x90] sm:$0xff] (!%p138_p2)  ;;  %v541_v30 = vld [vmem:[%s842_s1 + $0x98] sm:$0xff] (!%p138_p2)  ;;  %v542_v34 = vld [vmem:[%s842_s1 + $0xa0] sm:$0xff] (!%p138_p2) }
   0xc   : > { %645 = vmatprep.subr.bf16.mxu1 (!%p138_p2), %v644_v14  ;;  %v676_v32 = vpack.c.bf16 (!%p138_p2), %v541_v30, %v540_v29  ;;  %v543_v35 = vld [vmem:[%s842_s1 + $0xa8] sm:$0xff] (!%p138_p2)  ;;  %v544_v38 = vld [vmem:[%s842_s1 + $0xb0] sm:$0xff] (!%p138_p2)  ;;  %v545_v39 = vld [vmem:[%s842_s1 + $0xb8] sm:$0xff] (!%p138_p2) }
   0xd   : > { %s846_s13 = smov (!%p161_p3, %s517_s13), 1  ;;  %663 = vmatpush3.bf16.msra.mxu0 %v660_v5  ;;  %v680_v37 = vpack.c.bf16 %v543_v35, %v542_v34  ;;  %v684_v40 = vpack.c.bf16 %v545_v39, %v544_v38  ;;  %v548_v45 = vld [vmem:[%s843_s2] ss:$0 sm:$0xff] }
   0xe   : > { %s551_s30 = sshll.u32 %s846_s13, 4  ;;  %665 = vmatprep.subr.bf16.mxu0 %v664_v13 }
   0xf   : > { %s774_s10 = scalar_lea.vmem %s841_s0, %s551_s30  ;;  %647 = vmatpush3.bf16.msra.mxu1 %v644_v14  ;;  %s170_s22 = scalar_lea.vmem %s844_s3, %s551_s30 }
  0x10   : > { %v171_v19 = vld [vmem:[%s774_s10] sm:$0xff]  ;;  %649 = vmatprep.subr.bf16.mxu1 %v648_v20  ;;  %v172_v31 = vld [vmem:[%s774_s10 + $0x8] sm:$0x3f] }
  0x11   : > { %618 = vmatprep.mubr.msk.f32.mxu0 %vm192_vm0, %v171_v19  ;;  %v181_v21 = vld [vmem:[%s774_s10 + $0x1] sm:$0xff]  ;;  %667 = vmatpush3.bf16.msra.mxu0 %v664_v13  ;;  %v182_v36 = vld [vmem:[%s774_s10 + $0x9] sm:$0x3f] }
  0x12   : > { %599 = vmatprep.mubr.msk.f32.mxu1 %vm192_vm0, %v181_v21  ;;  %669 = vmatprep.subr.bf16.mxu0 %v668_v22  ;;  %v355_v33 = vld [vmem:[%s774_s10 + $0x2] sm:$0xff]  ;;  %v356_v41 = vld [vmem:[%s774_s10 + $0xa] sm:$0x3f] }
  0x13   : > { %651 = vmatpush3.bf16.msra.mxu1 %v648_v20 }
  0x14   : > { %653 = vmatprep.subr.bf16.mxu1 %v652_v27 }
  0x15   : > { %671 = vmatpush3.bf16.msra.mxu0 %v668_v22 }
  0x16   : > { %673 = vmatprep.subr.bf16.mxu0 %v672_v28 }
  0x17   : > { %655 = vmatpush3.bf16.msra.mxu1 %v652_v27 }
  0x18   : > { %619 = vmatmul.mubr.msk.f32.vlgmr.msra.gmra.mrb[0].mxu0 %vm192_vm0, %v172_v31 }
  0x19   : > { %675 = vmatpush3.bf16.msra.mxu0 %v672_v28  ;;  %637 = vmatprep.mubr.msk.f32.mxu0 %vm192_vm0, %v355_v33 }
  0x1a   : > { %677 = vmatprep.subr.bf16.mxu0 %v676_v32  ;;  %600 = vmatmul.mubr.msk.f32.vlgmr.msra.gmra.mrb[0].mxu1 %vm192_vm0, %v182_v36 }
  0x1d   : > { %679 = vmatpush3.bf16.msra.mxu0 %v676_v32 }
  0x1e   : > { %681 = vmatprep.subr.bf16.mxu0 %v680_v37 }
  0x21   : > { %683 = vmatpush3.bf16.msra.mxu0 %v680_v37 }
  0x22   : > { %685 = vmatprep.subr.bf16.mxu0 %v684_v40 }
  0x25   : > { %687 = vmatpush3.bf16.msra.mxu0 %v684_v40 }
  0x28   : > { %638 = vmatmul.mubr.msk.f32.vlgmr.msra.gmra.mrb[0].mxu0 %vm192_vm0, %v356_v41 }
  0xed   : > { %v601_v42 = vpop.f32.mrb[0].mxu1 }
  0xee   : > { %v265_v43 = vpop.f32.mrb[1].mxu1 }
  0xfb   : > { %v639_v44 = vpop.f32.mrb[0].mxu0 }
  0xfc   : > { %v688_v46 = vadd.f32 %v639_v44, %v601_v42  ;;  %v438_v47 = vpop.f32.mrb[1].mxu0 }
  0xfd   : > { %v689_v48 = vadd.f32 %v438_v47, %v265_v43 }
  0xfe   : > { %v457_v49 = vadd.f32 %v688_v46, %v548_v45 }
  0xff   : > { %v456_v50 = vadd.f32 %v689_v48, %v548_v45 }
 0x100   : > { %461 = vst.msk [vmem:[%s170_s22 + $0x8] sm:$0x3f] %vm460_vm1, %v457_v49 }
 0x101   : > { %459 = vst.msk [vmem:[%s170_s22] sm:$0xff] %vm458_vm2, %v456_v50 }
 0x102 PF: > { %s13_s12 = sadd.s32 1, %s706_s12  }
 0x103   : > { %p10_p4 = scmp.ge.s32.totalorder %s13_s12, 4  }
 0x105   :  { %12 = sbr.rel (!%p10_p4) target bundleno = 1 (0x1), region = 64 }

</bundles_post_ra>
